<compile_context>
chip_gen: v7x
topology: tpu7x:2x2x1
jax: 0.10.0
libtpu: 0.0.40
codegen_flags: <defaults>
</compile_context>

<pallas_src>
import functools
import math

import jax
import jax.numpy as jnp
import numpy as np
from jax import lax
from jax.experimental import pallas as pl
from jax.experimental.pallas import tpu as pltpu

NUM_LANES = 128
_LOG2E = 1.4426950408889634


def _lane_rep(x, width):
    """Expand a lane-replicated (rows, 128) stat array to (rows, width)."""
    rows, lanes = x.shape
    if width == lanes:
        return x
    if width < lanes:
        return x[:, :width]
    if width % lanes == 0:
        return jnp.tile(x, (1, width // lanes))
    return jnp.broadcast_to(x[:, :1], (rows, width))


def _flash_fwd_kernel(q_ref, k_ref, v_ref, o_ref, m_sc, l_sc, acc_sc, *, exp_dtype):
    """Online-softmax flash attention; KV blocks on the last (arbitrary) axis."""
    kv = pl.program_id(2)

    @pl.when(kv == 0)
    def _init():
        m_sc[...] = jnp.full(m_sc.shape, -jnp.inf, dtype=m_sc.dtype)
        l_sc[...] = jnp.zeros(l_sc.shape, dtype=l_sc.dtype)
        acc_sc[...] = jnp.zeros(acc_sc.shape, dtype=acc_sc.dtype)

    q = q_ref[...]            # (tq, D), pre-scaled by (1/sqrt(D)) * log2(e)
    k = k_ref[...]            # (tk, D)
    v = v_ref[...]            # (tk, D)

    # Scores on the MXU: contract last dims directly (no k transpose relayout).
    s = lax.dot_general(
        q, k,
        dimension_numbers=(((1,), (1,)), ((), ())),
        preferred_element_type=jnp.float32)              # (tq, tk) f32

    tq, tk = s.shape
    d = acc_sc.shape[-1]

    m_prev = m_sc[...]                                   # (tq, 128), lane-replicated
    l_prev = l_sc[...]                                   # (tq, 128)
    m_curr = jnp.max(s, axis=-1, keepdims=True)          # (tq, 1)
    m_next = jnp.maximum(m_prev, m_curr)                 # (tq, 128)
    alpha = jnp.exp2(m_prev - m_next)                    # (tq, 128) f32

    # exp2 on the EUP: bf16 path on v6e/v7x, f32 on v5e (no bf16 EUP there).
    p = jnp.exp2((s - _lane_rep(m_next, tk)).astype(exp_dtype))        # (tq, tk)
    p_sum = jnp.sum(p, axis=-1, keepdims=True, dtype=jnp.float32)      # (tq, 1)

    l_sc[...] = alpha * l_prev + p_sum
    acc_sc[...] = _lane_rep(alpha, d) * acc_sc[...] + jnp.dot(
        p.astype(v.dtype), v, preferred_element_type=jnp.float32)
    m_sc[...] = m_next

    @pl.when(kv == pl.num_programs(2) - 1)
    def _finalize():
        inv_l = pl.reciprocal(l_sc[...], approx=True)    # (tq, 128)
        o_ref[...] = (acc_sc[...] * _lane_rep(inv_l, d)).astype(o_ref.dtype)


def _vmem_capacity_bytes():
    """Physical VMEM per TensorCore; conservative (64 MiB) when unknown."""
    try:
        cap = getattr(pltpu.get_tpu_info(), "vmem_capacity_bytes", None)
        if cap:
            return int(cap)
    except Exception:
        pass
    try:
        kind = jax.devices()[0].device_kind.lower()
    except Exception:
        kind = ""
    if any(t in kind for t in ("v7", "tpu7", "7x")):
        return 64 * 1024 * 1024
    if any(t in kind for t in ("v5", "v6", "trillium")):
        return 128 * 1024 * 1024
    return 64 * 1024 * 1024


def _default_exp_dtype():
    """bf16 exp on chips with a bf16 EUP (v6e/v7x); f32 elsewhere (v5e/older)."""
    try:
        kind = jax.devices()[0].device_kind.lower()
    except Exception:
        return jnp.float32
    if any(t in kind for t in ("v6", "trillium", "v7", "tpu7", "7x")):
        return jnp.bfloat16
    return jnp.float32


def _select_tiles(S, D, in_bytes, out_bytes, budget, block_q=None, block_k=None):
    """Pick (tq, tk), preferring VMEM-resident K/V (tk == S), then larger tq."""

    def footprint(tq, tk):
        q_buf = 2 * tq * D * in_bytes           # double-buffered Q tile
        kv_buf = 2 * 2 * tk * D * in_bytes      # double-buffered K and V tiles
        o_buf = 2 * tq * D * out_bytes          # double-buffered output tile
        scratch = 2 * tq * NUM_LANES * 4 + tq * D * 4   # m, l, acc
        return q_buf + kv_buf + o_buf + scratch

    tq_cands = [block_q] if block_q else [512, 256, 128, 64, 32, 16, 8]
    tk_cands = [block_k] if block_k else [S, 2048, 1024, 512, 256, 128, 64, 32, 16, 8]

    for tk0 in tk_cands:                        # residency (tk == S) first
        tk = min(tk0, S)
        if S % tk:
            continue
        for tq0 in tq_cands:
            tq = min(tq0, S)
            if S % tq:
                continue
            if footprint(tq, tk) <= budget:
                return tq, tk, footprint(tq, tk)
    return S, S, footprint(S, S)                # full-extent blocks as last resort


def metal_flash_attention_forward(query, key, value, mask=None,
                                  *, block_q=None, block_k=None, exp_dtype=None):
    """Equivalent of MetalFlashAttention.forward: softmax(QK^T / sqrt(d)) V."""
    del mask  # never bound to the Metal kernel in the reference module
    B, H, S, D = query.shape
    BH = B * H
    # Fold softmax scale AND log2(e) (exp2 domain) into the q cast, once, in
    # the wrapper -- removes a per-KV-step (tq, D) multiply from the kernel.
    scale = (1.0 / math.sqrt(D)) * _LOG2E

    cdt = jnp.bfloat16 if query.dtype == jnp.float32 else query.dtype
    q = (query.reshape(BH, S, D) * scale).astype(cdt)
    k = key.reshape(BH, S, D).astype(cdt)
    v = value.reshape(BH, S, D).astype(cdt)

    in_bytes = jnp.dtype(cdt).itemsize
    out_bytes = jnp.dtype(query.dtype).itemsize
    vmem_cap = _vmem_capacity_bytes()
    budget = min(int(0.75 * vmem_cap), 96 * 1024 * 1024)   # <= ~48 MiB on v7x
    tq, tk, fp = _select_tiles(S, D, in_bytes, out_bytes, budget, block_q, block_k)
    vmem_limit = int(min(budget, max(2 * fp, 32 * 1024 * 1024)))

    if exp_dtype is None:
        exp_dtype = _default_exp_dtype()

    kernel = functools.partial(_flash_fwd_kernel, exp_dtype=exp_dtype)

    cost = pl.CostEstimate(
        flops=4 * BH * S * S * D,
        transcendentals=BH * S * S,
        bytes_accessed=3 * BH * S * D * in_bytes + BH * S * D * out_bytes)

    out = pl.pallas_call(
        kernel,
        out_shape=jax.ShapeDtypeStruct((BH, S, D), query.dtype),
        grid_spec=pltpu.PrefetchScalarGridSpec(
            num_scalar_prefetch=0,
            grid=(BH, S // tq, S // tk),
            in_specs=[
                # Leading BH block dim squeezed -> kernel sees 2-D (tile, D) refs.
                pl.BlockSpec((None, tq, D), lambda b, qi, ki: (b, qi, 0)),
                # When tk == S the K/V block index is constant across qi, so the
                # pipeline skips the re-DMA: K/V fetched once per batch-head.
                pl.BlockSpec((None, tk, D), lambda b, qi, ki: (b, ki, 0)),
                pl.BlockSpec((None, tk, D), lambda b, qi, ki: (b, ki, 0)),
            ],
            out_specs=pl.BlockSpec((None, tq, D), lambda b, qi, ki: (b, qi, 0)),
            scratch_shapes=[
                pltpu.VMEM((tq, NUM_LANES), jnp.float32),  # running max m (lane-replicated)
                pltpu.VMEM((tq, NUM_LANES), jnp.float32),  # running denom l
                pltpu.VMEM((tq, D), jnp.float32),          # running numerator acc
            ],
        ),
        compiler_params=pltpu.CompilerParams(
            dimension_semantics=("parallel", "parallel", "arbitrary"),
            vmem_limit_bytes=vmem_limit),
        cost_estimate=cost,
    )(q, k, v)

    return out.reshape(B, H, S, D)


def _reference_attention(q, k, v):
    """Pure-JAX f32 reference (from the same-precision inputs)."""
    d = q.shape[-1]
    qf = q.astype(jnp.float32)
    kf = k.astype(jnp.float32)
    vf = v.astype(jnp.float32)
    s = jnp.einsum("bhqd,bhkd->bhqk", qf, kf,
                   precision=lax.Precision.HIGHEST) / math.sqrt(d)
    p = jax.nn.softmax(s, axis=-1)
    return jnp.einsum("bhqk,bhkd->bhqd", p, vf, precision=lax.Precision.HIGHEST)


if __name__ == "__main__":
    # Small shapes consistent with (batch, num_heads, seq_len, head_dim).
    B, H, S, D = 2, 2, 128, 64
    rng = jax.random.PRNGKey(0)
    kq, kk, kvr = jax.random.split(rng, 3)
    query = jax.random.normal(kq, (B, H, S, D), dtype=jnp.float32)
    key_ = jax.random.normal(kk, (B, H, S, D), dtype=jnp.float32)
    value = jax.random.normal(kvr, (B, H, S, D), dtype=jnp.float32)

    out = jax.block_until_ready(metal_flash_attention_forward(query, key_, value))

    # Reference on the same bf16-rounded inputs the kernel consumes, with f32
    # math -- isolates the online-softmax/accumulation correctness.
    ref = jax.block_until_ready(_reference_attention(
        query.astype(jnp.bfloat16),
        key_.astype(jnp.bfloat16),
        value.astype(jnp.bfloat16)))
    np.testing.assert_allclose(np.asarray(out), np.asarray(ref),
                               rtol=2e-2, atol=2e-2)

    print("KERNEL_OK")
</pallas_src>

<mosaic_0001>
module attributes {stable_mosaic.version = 11 : i64} {
  func.func @_flash_fwd_kernel(%arg0: i32, %arg1: i32, %arg2: i32, %arg3: memref<1x128x64xbf16, #tpu.memory_space<vmem>>, %arg4: memref<1x128x64xbf16, #tpu.memory_space<vmem>>, %arg5: memref<1x128x64xbf16, #tpu.memory_space<vmem>>, %arg6: memref<1x128x64xf32, #tpu.memory_space<vmem>>, %arg7: memref<128x128xf32, #tpu.memory_space<vmem>>, %arg8: memref<128x128xf32, #tpu.memory_space<vmem>>, %arg9: memref<128x64xf32, #tpu.memory_space<vmem>>) attributes {dimension_semantics = [#tpu.dimension_semantics<parallel>, #tpu.dimension_semantics<parallel>, #tpu.dimension_semantics<arbitrary>], iteration_bounds = array<i64: 4, 1, 1>, scalar_prefetch = 0 : i64, scratch_operands = 3 : i64, tpu.core_type = #tpu.core_type<tc>, window_params = [{transform_indices = @transform_0, window_bounds = array<i64: 1, 128, 64>}, {transform_indices = @transform_1, window_bounds = array<i64: 1, 128, 64>}, {transform_indices = @transform_2, window_bounds = array<i64: 1, 128, 64>}, {transform_indices = @transform_3, window_bounds = array<i64: 1, 128, 64>}]} {
    %c0_i32 = arith.constant 0 : i32
    %0 = arith.cmpi eq, %arg2, %c0_i32 : i32
    %1 = arith.extui %0 : i1 to i32
    %c0_i32_0 = arith.constant 0 : i32
    %2 = arith.cmpi ne, %1, %c0_i32_0 : i32
    scf.if %2 {
      %cst_26 = arith.constant 0xFF800000 : f32
      %37 = vector.broadcast %cst_26 : f32 to vector<128x128xf32>
      %c0_27 = arith.constant 0 : index
      %c0_28 = arith.constant 0 : index
      %38 = vector.load %arg7[%c0_27, %c0_28] : memref<128x128xf32, #tpu.memory_space<vmem>>, vector<128x128xf32>
      tpu.vector_store %arg7[%c0_27, %c0_28], %37 {strides = array<i32>} : memref<128x128xf32, #tpu.memory_space<vmem>>, vector<128x128xf32>,
      %cst_29 = arith.constant 0.000000e+00 : f32
      %39 = vector.broadcast %cst_29 : f32 to vector<128x128xf32>
      %c0_30 = arith.constant 0 : index
      %c0_31 = arith.constant 0 : index
      %40 = vector.load %arg8[%c0_30, %c0_31] : memref<128x128xf32, #tpu.memory_space<vmem>>, vector<128x128xf32>
      tpu.vector_store %arg8[%c0_30, %c0_31], %39 {strides = array<i32>} : memref<128x128xf32, #tpu.memory_space<vmem>>, vector<128x128xf32>,
      %cst_32 = arith.constant 0.000000e+00 : f32
      %41 = vector.broadcast %cst_32 : f32 to vector<128x64xf32>
      %c0_33 = arith.constant 0 : index
      %c0_34 = arith.constant 0 : index
      %42 = vector.load %arg9[%c0_33, %c0_34] : memref<128x64xf32, #tpu.memory_space<vmem>>, vector<128x64xf32>
      tpu.vector_store %arg9[%c0_33, %c0_34], %41 {strides = array<i32>} : memref<128x64xf32, #tpu.memory_space<vmem>>, vector<128x64xf32>,
    } else {
    }
    %c0 = arith.constant 0 : index
    %c0_1 = arith.constant 0 : index
    %c0_2 = arith.constant 0 : index
    %3 = vector.load %arg3[%c0, %c0_1, %c0_2] : memref<1x128x64xbf16, #tpu.memory_space<vmem>>, vector<1x128x64xbf16>
    %4 = vector.shape_cast %3 : vector<1x128x64xbf16> to vector<128x64xbf16>
    %c0_3 = arith.constant 0 : index
    %c0_4 = arith.constant 0 : index
    %c0_5 = arith.constant 0 : index
    %5 = vector.load %arg4[%c0_3, %c0_4, %c0_5] : memref<1x128x64xbf16, #tpu.memory_space<vmem>>, vector<1x128x64xbf16>
    %6 = vector.shape_cast %5 : vector<1x128x64xbf16> to vector<128x64xbf16>
    %c0_6 = arith.constant 0 : index
    %c0_7 = arith.constant 0 : index
    %c0_8 = arith.constant 0 : index
    %7 = vector.load %arg5[%c0_6, %c0_7, %c0_8] : memref<1x128x64xbf16, #tpu.memory_space<vmem>>, vector<1x128x64xbf16>
    %8 = vector.shape_cast %7 : vector<1x128x64xbf16> to vector<128x64xbf16>
    %cst = arith.constant dense<0.000000e+00> : vector<128x128xf32>
    %9 = tpu.matmul %4, %6, %cst {dimension_numbers = #tpu.dot_dimension_numbers<[1], [1], [0], [0], [0, 0, 1, 0], [], []>} : vector<128x64xbf16>, vector<128x64xbf16>, vector<128x128xf32> -> vector<128x128xf32>
    %c0_9 = arith.constant 0 : index
    %c0_10 = arith.constant 0 : index
    %10 = vector.load %arg7[%c0_9, %c0_10] : memref<128x128xf32, #tpu.memory_space<vmem>>, vector<128x128xf32>
    %c0_11 = arith.constant 0 : index
    %c0_12 = arith.constant 0 : index
    %11 = vector.load %arg8[%c0_11, %c0_12] : memref<128x128xf32, #tpu.memory_space<vmem>>, vector<128x128xf32>
    %cst_13 = arith.constant dense<0xFF800000> : vector<128xf32>
    %12 = vector.multi_reduction <maximumf>, %9, %cst_13 [1] : vector<128x128xf32> to vector<128xf32>
    %13 = vector.shape_cast %12 : vector<128xf32> to vector<128x1xf32>
    %14 = vector.broadcast %13 : vector<128x1xf32> to vector<128x128xf32>
    %15 = arith.maximumf %10, %14 : vector<128x128xf32>
    %16 = arith.subf %10, %15 : vector<128x128xf32>
    %17 = math.exp2 %16 : vector<128x128xf32>
    %18 = arith.subf %9, %15 : vector<128x128xf32>
    %19 = math.exp2 %18 : vector<128x128xf32>
    %cst_14 = arith.constant dense<0.000000e+00> : vector<128xf32>
    %20 = vector.multi_reduction <add>, %19, %cst_14 [1] : vector<128x128xf32> to vector<128xf32>
    %21 = vector.shape_cast %20 : vector<128xf32> to vector<128x1xf32>
    %22 = arith.mulf %17, %11 : vector<128x128xf32>
    %23 = vector.broadcast %21 : vector<128x1xf32> to vector<128x128xf32>
    %24 = arith.addf %22, %23 : vector<128x128xf32>
    %c0_15 = arith.constant 0 : index
    %c0_16 = arith.constant 0 : index
    %25 = vector.load %arg8[%c0_15, %c0_16] : memref<128x128xf32, #tpu.memory_space<vmem>>, vector<128x128xf32>
    tpu.vector_store %arg8[%c0_15, %c0_16], %24 {strides = array<i32>} : memref<128x128xf32, #tpu.memory_space<vmem>>, vector<128x128xf32>,
    %26 = vector.extract_strided_slice %17 {offsets = [0, 0], sizes = [128, 64], strides = [1, 1]} : vector<128x128xf32> to vector<128x64xf32>
    %c0_17 = arith.constant 0 : index
    %c0_18 = arith.constant 0 : index
    %27 = vector.load %arg9[%c0_17, %c0_18] : memref<128x64xf32, #tpu.memory_space<vmem>>, vector<128x64xf32>
    %28 = arith.mulf %26, %27 : vector<128x64xf32>
    %29 = arith.truncf %19 : vector<128x128xf32> to vector<128x128xbf16>
    %cst_19 = arith.constant dense<0.000000e+00> : vector<128x64xf32>
    %30 = tpu.matmul %29, %8, %cst_19 {dimension_numbers = #tpu.dot_dimension_numbers<[1], [0], [0], [1], [0, 0, 1, 1], [], []>} : vector<128x128xbf16>, vector<128x64xbf16>, vector<128x64xf32> -> vector<128x64xf32>
    %31 = arith.addf %28, %30 : vector<128x64xf32>
    %c0_20 = arith.constant 0 : index
    %c0_21 = arith.constant 0 : index
    %32 = vector.load %arg9[%c0_20, %c0_21] : memref<128x64xf32, #tpu.memory_space<vmem>>, vector<128x64xf32>
    tpu.vector_store %arg9[%c0_20, %c0_21], %31 {strides = array<i32>} : memref<128x64xf32, #tpu.memory_space<vmem>>, vector<128x64xf32>,
    %c0_22 = arith.constant 0 : index
    %c0_23 = arith.constant 0 : index
    %33 = vector.load %arg7[%c0_22, %c0_23] : memref<128x128xf32, #tpu.memory_space<vmem>>, vector<128x128xf32>
    tpu.vector_store %arg7[%c0_22, %c0_23], %15 {strides = array<i32>} : memref<128x128xf32, #tpu.memory_space<vmem>>, vector<128x128xf32>,
    %c0_i32_24 = arith.constant 0 : i32
    %34 = arith.cmpi eq, %arg2, %c0_i32_24 : i32
    %35 = arith.extui %34 : i1 to i32
    %c0_i32_25 = arith.constant 0 : i32
    %36 = arith.cmpi ne, %35, %c0_i32_25 : i32
    scf.if %36 {
      %c0_26 = arith.constant 0 : index
      %c0_27 = arith.constant 0 : index
      %37 = vector.load %arg8[%c0_26, %c0_27] : memref<128x128xf32, #tpu.memory_space<vmem>>, vector<128x128xf32>
      %38 = tpu.reciprocal %37 {approx = true} : vector<128x128xf32> -> vector<128x128xf32>
      %c0_28 = arith.constant 0 : index
      %c0_29 = arith.constant 0 : index
      %39 = vector.load %arg9[%c0_28, %c0_29] : memref<128x64xf32, #tpu.memory_space<vmem>>, vector<128x64xf32>
      %40 = vector.extract_strided_slice %38 {offsets = [0, 0], sizes = [128, 64], strides = [1, 1]} : vector<128x128xf32> to vector<128x64xf32>
      %41 = arith.mulf %39, %40 : vector<128x64xf32>
      %c0_30 = arith.constant 0 : index
      %c0_31 = arith.constant 0 : index
      %c0_32 = arith.constant 0 : index
      %42 = vector.load %arg6[%c0_30, %c0_31, %c0_32] : memref<1x128x64xf32, #tpu.memory_space<vmem>>, vector<1x128x64xf32>
      %43 = vector.shape_cast %42 : vector<1x128x64xf32> to vector<128x64xf32>
      %44 = vector.shape_cast %41 : vector<128x64xf32> to vector<1x128x64xf32>
      tpu.vector_store %arg6[%c0_30, %c0_31, %c0_32], %44 {strides = array<i32>} : memref<1x128x64xf32, #tpu.memory_space<vmem>>, vector<1x128x64xf32>,
    } else {
    }
    return
  }
  func.func @transform_0(%arg0: i32, %arg1: i32, %arg2: i32) -> (i32, i32, i32) {
    %c0_i32 = arith.constant 0 : i32
    %c0_i32_0 = arith.constant 0 : i32
    return %arg0, %arg1, %c0_i32 : i32, i32, i32
  }
  func.func @transform_1(%arg0: i32, %arg1: i32, %arg2: i32) -> (i32, i32, i32) {
    %c0_i32 = arith.constant 0 : i32
    %c0_i32_0 = arith.constant 0 : i32
    return %arg0, %arg2, %c0_i32 : i32, i32, i32
  }
  func.func @transform_2(%arg0: i32, %arg1: i32, %arg2: i32) -> (i32, i32, i32) {
    %c0_i32 = arith.constant 0 : i32
    %c0_i32_0 = arith.constant 0 : i32
    return %arg0, %arg2, %c0_i32 : i32, i32, i32
  }
  func.func @transform_3(%arg0: i32, %arg1: i32, %arg2: i32) -> (i32, i32, i32) {
    %c0_i32 = arith.constant 0 : i32
    %c0_i32_0 = arith.constant 0 : i32
    return %arg0, %arg1, %c0_i32 : i32, i32, i32
  }
}

</mosaic_0001>

<bundles_post_ra>
// kernel: tpu_custom_call.1
= control target key start
LH: loop header
LB: loop body
LE: loop exit
PB: predicated region body
PF: predicated region fallthrough
CT: control target
= control target key end

     0   :  { %s1628_s12 = smov 0   ;;  %s1630_s13 = smov 0   ;;  %s1958_s0 = inlined_call_operand.vmem [shape: bf16[4,128,64], index: 0, kind: input, shape index: {}]   ;;  %s1959_s1 = inlined_call_operand.vmem [shape: bf16[4,128,64], index: 1, kind: input, shape index: {}]   ;;  %s1960_s2 = inlined_call_operand.vmem [shape: bf16[4,128,64], index: 2, kind: input, shape index: {}]   ;;  %s1961_s3 = inlined_call_operand.vmem [shape: f32[4,128,64], index: 3, kind: output, shape index: {}]  }
   0x1   :  { %s1632_s14 = smov 0  }
   0x2 LB: > { %s32_s15 = sadd.s32 1, %s1601_s13  ;;  %p1287_p0 = scmp.ge.s32.totalorder %s1605_s14, 1  ;;  %s1605_s14 = sphi %s1632_s14, %s13_s14   ;;  %s1601_s13 = sphi %s1630_s13, %s1963_s13   ;;  %s1597_s12 = sphi %s1628_s12, %s1962_s12  }
   0x3   : > { %p34_p1 = scmp.ge.s32.totalorder %s32_s15, 4  ;;  %p199_p2 = scmp.lt.s32.totalorder %s1605_s14, 5 }
   0x5   : > { %s1965_s15 = smov (%p34_p1, %s32_s15), 0  ;;  %p200_p3 = pnand %p1287_p0, %p199_p2 }
   0x6   : > { %p250_p4 = scmp.lt.s32.totalorder (!%p200_p3), %s1597_s12, 3  ;;  %vm326_vm0 = vcmask (!%p200_p3), 523264   ;;  %v1607_v41 = vmov (!%p200_p3), 0.0  }
   0x7   : > { %203 = sbr.rel (%p200_p3) target bundleno = 710 (0x2c6), region = 32  ;;  %329 = vst.msk [vmem:[#allocation4 + $0x10] sm:$0xff] (!%p200_p3), %vm326_vm0, %v1607_v41  ;;  %327 = vst.msk [vmem:[#allocation4] sm:$0xff] (!%p200_p3), %vm326_vm0, %v1607_v41 }
   0x8   : > { %328 = vst.msk [vmem:[#allocation4 + $0x8] sm:$0xff] (!%p200_p3), %vm326_vm0, %v1607_v41  ;;  %330 = vst.msk [vmem:[#allocation4 + $0x18] sm:$0xff] (!%p200_p3), %vm326_vm0, %v1607_v41 }
   0x9   : > { %331 = vst.msk [vmem:[#allocation4 + $0x20] sm:$0xff] (!%p200_p3), %vm326_vm0, %v1607_v41  ;;  %332 = vst.msk [vmem:[#allocation4 + $0x28] sm:$0xff] (!%p200_p3), %vm326_vm0, %v1607_v41 }
   0xa   : > { %333 = vst.msk [vmem:[#allocation4 + $0x30] sm:$0xff] (!%p200_p3), %vm326_vm0, %v1607_v41  ;;  %334 = vst.msk [vmem:[#allocation4 + $0x38] sm:$0xff] (!%p200_p3), %vm326_vm0, %v1607_v41 }
   0xb   : > { %335 = vst.msk [vmem:[#allocation4 + $0x40] sm:$0xff] (!%p200_p3), %vm326_vm0, %v1607_v41  ;;  %336 = vst.msk [vmem:[#allocation4 + $0x48] sm:$0xff] (!%p200_p3), %vm326_vm0, %v1607_v41 }
   0xc   : > { %337 = vst.msk [vmem:[#allocation4 + $0x50] sm:$0xff] (!%p200_p3), %vm326_vm0, %v1607_v41  ;;  %338 = vst.msk [vmem:[#allocation4 + $0x58] sm:$0xff] (!%p200_p3), %vm326_vm0, %v1607_v41 }
   0xd   : > { %339 = vst.msk [vmem:[#allocation4 + $0x60] sm:$0xff] (!%p200_p3), %vm326_vm0, %v1607_v41  ;;  %340 = vst.msk [vmem:[#allocation4 + $0x68] sm:$0xff] (!%p200_p3), %vm326_vm0, %v1607_v41 }
   0xe   : > { %s1967_s12 = smov (!%p250_p4, %s1597_s12), 3  ;;  %341 = vst.msk [vmem:[#allocation4 + $0x70] sm:$0xff] %vm326_vm0, %v1607_v41  ;;  %342 = vst.msk [vmem:[#allocation4 + $0x78] sm:$0xff] %vm326_vm0, %v1607_v41 }
   0xf   : > { %s1649_s16 = sshll.u32 %s1967_s12, 6  ;;  %s1333_s26 = sshll.u32 %s1967_s12, 7 }
  0x10   : > { %s1655_s19 = scalar_lea.vmem %s1959_s1, %s1649_s16  ;;  %s1666_s22 = scalar_lea.vmem %s1958_s0, %s1649_s16 }
  0x11   : > { %v1463_v0 = vld [vmem:[%s1655_s19] sm:$0xff]   ;;  %v1464_v1 = vld [vmem:[%s1655_s19 + $0x8] sm:$0xff]   ;;  %v1465_v3 = vld [vmem:[%s1655_s19 + $0x10] sm:$0xff]   ;;  %s1707_s25 = scalar_lea.vmem %s1960_s2, %s1649_s16  ;;  %s1883_s29 = scalar_lea.vmem %s1961_s3, %s1333_s26 }
  0x12   : > { %1430 = vmatprep.subr.msk.bf16.mxu0 %vm326_vm0, %v1463_v0  ;;  %v497_v2 = vsel %vm326_vm0, %v1463_v0, 0  ;;  %v500_v4 = vsel %vm326_vm0, %v1464_v1, 0  ;;  %v1471_v5 = vld [vmem:[%s1666_s22] sm:$0xff]   ;;  %v503_v6 = vsel %vm326_vm0, %v1465_v3, 0  ;;  %v1466_v7 = vld [vmem:[%s1655_s19 + $0x18] sm:$0xff]   ;;  %v1468_v11 = vld [vmem:[%s1655_s19 + $0x28] sm:$0xff]  }
  0x13   : > { %1367 = vmatpush3.bf16.xpose.msra.mxu0 %v497_v2  ;;  %1382 = vmatprep.mubr.msk.bf16.mxu0 %vm326_vm0, %v1471_v5  ;;  %v506_v8 = vsel %vm326_vm0, %v1466_v7, 0  ;;  %v1467_v9 = vld [vmem:[%s1655_s19 + $0x20] sm:$0xff]   ;;  %v512_v12 = vsel %vm326_vm0, %v1468_v11, 0  ;;  %v1469_v13 = vld [vmem:[%s1655_s19 + $0x30] sm:$0xff]   ;;  %v1470_v15 = vld [vmem:[%s1655_s19 + $0x38] sm:$0xff]  }
  0x14   : > { %1431 = vmatprep.subr.msk.bf16.mxu0 %vm326_vm0, %v1464_v1  ;;  %v509_v10 = vsel %vm326_vm0, %v1467_v9, 0  ;;  %v515_v14 = vsel %vm326_vm0, %v1469_v13, 0  ;;  %v518_v16 = vsel %vm326_vm0, %v1470_v15, 0  ;;  %v1472_v17 = vld [vmem:[%s1666_s22 + $0x8] sm:$0xff]   ;;  %v1473_v18 = vld [vmem:[%s1666_s22 + $0x10] sm:$0xff]   ;;  %v1474_v19 = vld [vmem:[%s1666_s22 + $0x18] sm:$0xff]  }
  0x15   : > { %v1475_v20 = vld [vmem:[%s1666_s22 + $0x20] sm:$0xff]   ;;  %v1476_v21 = vld [vmem:[%s1666_s22 + $0x28] sm:$0xff]   ;;  %v1477_v22 = vld [vmem:[%s1666_s22 + $0x30] sm:$0xff]  }
  0x16   : > { %v1478_v23 = vld [vmem:[%s1666_s22 + $0x38] sm:$0xff]   ;;  %v1479_v24 = vld [vmem:[%s1707_s25] sm:$0xff]   ;;  %v1480_v25 = vld [vmem:[%s1707_s25 + $0x8] sm:$0xff]  }
  0x17   : > { %1398 = vmatprep.subr.bf16.mxu1 %v1479_v24  ;;  %v1481_v26 = vld [vmem:[%s1707_s25 + $0x10] sm:$0xff]   ;;  %v1482_v36 = vld [vmem:[%s1707_s25 + $0x18] sm:$0xff]   ;;  %v1483_v40 = vld [vmem:[%s1707_s25 + $0x20] sm:$0xff]  }
  0x18   : > { %1399 = vmatpush3.bf16.msra.mxu1 %v1479_v24  ;;  %v1484_v43 = vld [vmem:[%s1707_s25 + $0x28] sm:$0xff]   ;;  %v1485_v47 = vld [vmem:[%s1707_s25 + $0x30] sm:$0xff]   ;;  %v1486_v48 = vld [vmem:[%s1707_s25 + $0x38] sm:$0xff]  }
  0x19   : > { %1400 = vmatprep.subr.bf16.mxu1 %v1480_v25 }
  0x1b   : > { %1369 = vmatpush3.bf16.xpose.msra.mxu0 %v500_v4 }
  0x1c   : > { %1432 = vmatprep.subr.msk.bf16.mxu0 %vm326_vm0, %v1465_v3  ;;  %1401 = vmatpush3.bf16.msra.mxu1 %v1480_v25 }
  0x1d   : > { %1402 = vmatprep.subr.bf16.mxu1 %v1481_v26 }
  0x20   : > { %1403 = vmatpush3.bf16.msra.mxu1 %v1481_v26 }
  0x21   : > { %1404 = vmatprep.subr.bf16.mxu1 %v1482_v36 }
  0x23   : > { %1371 = vmatpush3.bf16.xpose.msra.mxu0 %v503_v6 }
  0x24   : > { %1433 = vmatprep.subr.msk.bf16.mxu0 %vm326_vm0, %v1466_v7  ;;  %1405 = vmatpush3.bf16.msra.mxu1 %v1482_v36 }
  0x25   : > { %1406 = vmatprep.subr.bf16.mxu1 %v1483_v40 }
  0x28   : > { %1407 = vmatpush3.bf16.msra.mxu1 %v1483_v40 }
  0x29   : > { %1408 = vmatprep.subr.bf16.mxu1 %v1484_v43 }
  0x2b   : > { %1373 = vmatpush3.bf16.xpose.msra.mxu0 %v506_v8 }
  0x2c   : > { %1434 = vmatprep.subr.msk.bf16.mxu0 %vm326_vm0, %v1467_v9  ;;  %1409 = vmatpush3.bf16.msra.mxu1 %v1484_v43 }
  0x2d   : > { %1410 = vmatprep.subr.bf16.mxu1 %v1485_v47 }
  0x30   : > { %1411 = vmatpush3.bf16.msra.mxu1 %v1485_v47 }
  0x31   : > { %1412 = vmatprep.subr.bf16.mxu1 %v1486_v48 }
  0x33   : > { %1375 = vmatpush3.bf16.xpose.msra.mxu0 %v509_v10 }
  0x34   : > { %1435 = vmatprep.subr.msk.bf16.mxu0 %vm326_vm0, %v1468_v11  ;;  %1413 = vmatpush3.bf16.msra.mxu1 %v1486_v48 }
  0x3b   : > { %1377 = vmatpush3.bf16.xpose.msra.mxu0 %v512_v12 }
  0x3c   : > { %1436 = vmatprep.subr.msk.bf16.mxu0 %vm326_vm0, %v1469_v13 }
  0x43   : > { %1379 = vmatpush3.bf16.xpose.msra.mxu0 %v515_v14 }
  0x44   : > { %1437 = vmatprep.subr.msk.bf16.mxu0 %vm326_vm0, %v1470_v15 }
  0x4b   : > { %1381 = vmatpush3.bf16.xpose.msra.mxu0 %v518_v16 }
  0x52   : > { %1383 = vmatmul.mubr.msk.bf16.vlgmr.msra.gmra.mrb[0].mxu0 %vm326_vm0, %v1472_v17 }
  0x53   : > { %1386 = vmatprep.mubr.msk.bf16.mxu0 %vm326_vm0, %v1473_v18 }
  0x5a   : > { %1387 = vmatmul.mubr.msk.bf16.gmra.mrb[4].mxu0 %vm326_vm0, %v1474_v19 }
  0x5b   : > { %1390 = vmatprep.mubr.msk.bf16.mxu0 %vm326_vm0, %v1475_v20 }
  0x62   : > { %1391 = vmatmul.mubr.msk.bf16.gmra.mrb[8].mxu0 %vm326_vm0, %v1476_v21 }
  0x63   : > { %1394 = vmatprep.mubr.msk.bf16.mxu0 %vm326_vm0, %v1477_v22 }
  0x6a   : > { %1395 = vmatmul.mubr.msk.bf16.gmra.mrb[12].mxu0 %vm326_vm0, %v1478_v23 }
 0x125   : > { %v1712_v27 = vpop.f32.mrb[0].mxu0 }
 0x126   : > { %653 = vmax.xlane.f32.xlu1 %v1712_v27  ;;  %v1715_v28 = vpop.f32.mrb[1].mxu0 }
 0x127   : > { %649 = vmax.xlane.f32.xlu0 %v1715_v28  ;;  %v1718_v29 = vpop.f32.mrb[2].mxu0 }
 0x128   : > { %v1720_v30 = vpop.f32.mrb[3].mxu0 }
 0x12a   : > { %655 = vmax.xlane.f32.xlu1 %v1718_v29 }
 0x12b   : > { %651 = vmax.xlane.f32.xlu0 %v1720_v30 }
 0x12d   : > { %v1724_v31 = vpop.f32.mrb[4].mxu0 }
 0x12e   : > { %v1726_v32 = vpop.f32.mrb[5].mxu0 }
 0x12f   : > { %657 = vmax.xlane.f32.xlu0 %v1726_v32  ;;  %v1729_v33 = vpop.f32.mrb[6].mxu0 }
 0x130   : > { %v1731_v34 = vpop.f32.mrb[7].mxu0 }
 0x131   : > { %659 = vmax.xlane.f32.xlu1 %v1731_v34 }
 0x133   : > { %661 = vmax.xlane.f32.xlu0 %v1724_v31 }
 0x135   : > { %663 = vmax.xlane.f32.xlu1 %v1729_v33  ;;  %v1736_v35 = vpop.f32.mrb[8].mxu0 }
 0x136   : > { %v1739_v37 = vpop.f32.mrb[9].mxu0 }
 0x137   : > { %665 = vmax.xlane.f32.xlu0 %v1739_v37  ;;  %v1742_v38 = vpop.f32.mrb[10].mxu0 }
 0x138   : > { %v1744_v39 = vpop.f32.mrb[11].mxu0 }
 0x139   : > { %667 = vmax.xlane.f32.xlu1 %v1744_v39 }
 0x13b   : > { %669 = vmax.xlane.f32.xlu0 %v1736_v35 }
 0x13d   : > { %671 = vmax.xlane.f32.xlu1 %v1742_v38  ;;  %v1766_v42 = vpop.f32.mrb[12].mxu0 }
 0x13e   : > { %v1769_v44 = vpop.f32.mrb[13].mxu0 }
 0x13f   : > { %673 = vmax.xlane.f32.xlu0 %v1769_v44  ;;  %v1772_v45 = vpop.f32.mrb[14].mxu0 }
 0x140   : > { %v1774_v46 = vpop.f32.mrb[15].mxu0 }
 0x141   : > { %675 = vmax.xlane.f32.xlu1 %v1774_v46 }
 0x143   : > { %677 = vmax.xlane.f32.xlu0 %v1766_v42 }
 0x145   : > { %679 = vmax.xlane.f32.xlu1 %v1772_v45 }
 0x1b3   : > { %v1781_v49 = vpop.xlane.xlu1 %653 }
 0x1b4   : > { %v731_v50 = vsub.f32 %v1712_v27, %v1781_v49  ;;  %v1785_v51 = vpop.xlane.xlu0 %649  ;;  %v699_v41 = vsub.f32 -inf, %v1781_v49 }
 0x1b5   : > { %v729_v52 = vsub.f32 %v1715_v28, %v1785_v51  ;;  %v697_v43 = vsub.f32 -inf, %v1785_v51 }
 0x1b6   : > { %1487 = vpow2.f32 %v731_v50 }
 0x1b7   : > { %v1789_v53 = vpop.xlane.xlu1 %655  ;;  %1489 = vpow2.f32 %v729_v52 }
 0x1b8   : > { %v732_v54 = vsub.f32 %v1718_v29, %v1789_v53  ;;  %v1793_v55 = vpop.xlane.xlu0 %651 }
 0x1b9   : > { %v730_v56 = vsub.f32 %v1720_v30, %v1793_v55 }
 0x1ba   : > { %1491 = vpow2.f32 %v732_v54 }
 0x1bb   : > { %1493 = vpow2.f32 %v730_v56 }
 0x1bc   : > { %v1797_v57 = vpop.xlane.xlu0 %657 }
 0x1bd   : > { %v733_v58 = vsub.f32 %v1726_v32, %v1797_v57  ;;  %v701_v52 = vsub.f32 -inf, %v1797_v57 }
 0x1be   : > { %v1801_v59 = vpop.xlane.xlu1 %659 }
 0x1bf   : > { %v734_v60 = vsub.f32 %v1731_v34, %v1801_v59  ;;  %1495 = vpow2.f32 %v733_v58  ;;  %v702_v51 = vsub.f32 -inf, %v1801_v59 }
 0x1c0   : > { %v1805_v61 = vpop.xlane.xlu0 %661  ;;  %v1488_v62 = vpop.eup %1487 }
 0x1c1   : > { %v735_v63 = vsub.f32 %v1724_v31, %v1805_v61  ;;  %1497 = vpow2.f32 %v734_v60  ;;  %765 = vadd.xlane.f32.xlu0 %v1488_v62  ;;  %v1490_v2 = vpop.eup %1489  ;;  %v703_v48 = vsub.f32 -inf, %v1805_v61 }
 0x1c2   : > { %v1809_v0 = vpop.xlane.xlu1 %663 }
 0x1c3   : > { %v736_v1 = vsub.f32 %v1729_v33, %v1809_v0  ;;  %1499 = vpow2.f32 %v735_v63  ;;  %v704_v49 = vsub.f32 -inf, %v1809_v0 }
 0x1c4   : > { %v1813_v3 = vpop.xlane.xlu0 %665  ;;  %v1492_v4 = vpop.eup %1491 }
 0x1c5   : > { %v737_v5 = vsub.f32 %v1739_v37, %v1813_v3  ;;  %1501 = vpow2.f32 %v736_v1  ;;  %761 = vadd.xlane.f32.xlu0 %v1490_v2  ;;  %767 = vadd.xlane.f32.xlu1 %v1492_v4  ;;  %v874_v7 = vpack.c.bf16 %v1492_v4, %v1488_v62  ;;  %v1494_v8 = vpop.eup %1493  ;;  %v705_v58 = vsub.f32 -inf, %v1813_v3 }
 0x1c6   : > { %v1817_v6 = vpop.xlane.xlu1 %667  ;;  %v873_v10 = vpack.c.bf16 %v1494_v8, %v1490_v2 }
 0x1c7   : > { %v738_v9 = vsub.f32 %v1744_v39, %v1817_v6  ;;  %1503 = vpow2.f32 %v737_v5  ;;  %v706_v63 = vsub.f32 -inf, %v1817_v6 }
 0x1c8   : > { %v1821_v11 = vpop.xlane.xlu0 %669  ;;  %1414 = vmatprep.mubr.bf16.mxu1 %v873_v10  ;;  %v844_v10 = vld [vmem:[#allocation4 + $0x18] sm:$0xff] }
 0x1c9   : > { %v739_v12 = vsub.f32 %v1736_v35, %v1821_v11  ;;  %1505 = vpow2.f32 %v738_v9  ;;  %763 = vadd.xlane.f32.xlu1 %v1494_v8  ;;  %v1496_v14 = vpop.eup %1495  ;;  %1415 = vmatmul.mubr.bf16.vlgmr.msra.gmra.mrb[0].mxu1 %v874_v7  ;;  %v707_v61 = vsub.f32 -inf, %v1821_v11  ;;  %v843_v7 = vld [vmem:[#allocation4 + $0x10] sm:$0xff]  ;;  %v841_v9 = vld [vmem:[#allocation4] sm:$0xff] }
 0x1ca   : > { %v1825_v13 = vpop.xlane.xlu1 %671 }
 0x1cb   : > { %v740_v15 = vsub.f32 %v1742_v38, %v1825_v13  ;;  %v1498_v16 = vpop.eup %1497  ;;  %1507 = vpow2.f32 %v739_v12  ;;  %v708_v59 = vsub.f32 -inf, %v1825_v13  ;;  %v842_v12 = vld [vmem:[#allocation4 + $0x8] sm:$0xff] }
 0x1cc   : > { %v1829_v17 = vpop.xlane.xlu0 %673  ;;  %v875_v19 = vpack.c.bf16 %v1498_v16, %v1496_v14 }
 0x1cd   : > { %v741_v18 = vsub.f32 %v1769_v44, %v1829_v17  ;;  %v1500_v20 = vpop.eup %1499  ;;  %1509 = vpow2.f32 %v740_v15  ;;  %v700_v44 = vsub.f32 -inf, %v1789_v53 }
 0x1ce   : > { %v1833_v21 = vpop.xlane.xlu1 %675  ;;  %1418 = vmatprep.mubr.bf16.mxu1 %v875_v19  ;;  %773 = vadd.xlane.f32.xlu0 %v1500_v20 }
 0x1cf   : > { %v742_v22 = vsub.f32 %v1774_v46, %v1833_v21  ;;  %v1502_v23 = vpop.eup %1501  ;;  %1511 = vpow2.f32 %v741_v18  ;;  %v698_v46 = vsub.f32 -inf, %v1793_v55  ;;  %v709_v18 = vsub.f32 -inf, %v1829_v17 }
 0x1d0   : > { %v1837_v24 = vpop.xlane.xlu0 %677  ;;  %775 = vadd.xlane.f32.xlu1 %v1502_v23  ;;  %v876_v26 = vpack.c.bf16 %v1502_v23, %v1500_v20 }
 0x1d1   : > { %v743_v25 = vsub.f32 %v1766_v42, %v1837_v24  ;;  %1513 = vpow2.f32 %v742_v22  ;;  %v1504_v28 = vpop.eup %1503 }
 0x1d2   : > { %v1841_v27 = vpop.xlane.xlu1 %679  ;;  %1419 = vmatmul.mubr.bf16.gmra.mrb[4].mxu1 %v876_v26  ;;  %769 = vadd.xlane.f32.xlu0 %v1496_v14 }
 0x1d3   : > { %v744_v29 = vsub.f32 %v1772_v45, %v1841_v27  ;;  %v1506_v30 = vpop.eup %1505  ;;  %1515 = vpow2.f32 %v743_v25  ;;  %v711_v25 = vsub.f32 -inf, %v1837_v24 }
 0x1d4   : > { %771 = vadd.xlane.f32.xlu1 %v1498_v16  ;;  %v877_v31 = vpack.c.bf16 %v1506_v30, %v1504_v28 }
 0x1d5   : > { %v1508_v32 = vpop.eup %1507  ;;  %1517 = vpow2.f32 %v744_v29 }
 0x1d6   : > { %1422 = vmatprep.mubr.bf16.mxu1 %v877_v31  ;;  %781 = vadd.xlane.f32.xlu0 %v1508_v32  ;;  %1519 = vpow2.f32 %v699_v41 }
 0x1d7   : > { %v1510_v33 = vpop.eup %1509  ;;  %1521 = vpow2.f32 %v697_v43 }
 0x1d8   : > { %783 = vadd.xlane.f32.xlu1 %v1510_v33  ;;  %v878_v34 = vpack.c.bf16 %v1510_v33, %v1508_v32  ;;  %1523 = vpow2.f32 %v700_v44  ;;  %v710_v32 = vsub.f32 -inf, %v1833_v21  ;;  %v847_v21 = vld [vmem:[#allocation4 + $0x30] sm:$0xff] }
 0x1d9   : > { %v1512_v35 = vpop.eup %1511  ;;  %1525 = vpow2.f32 %v698_v46  ;;  %v848_v46 = vld [vmem:[#allocation4 + $0x38] sm:$0xff] }
 0x1da   : > { %1423 = vmatmul.mubr.bf16.gmra.mrb[8].mxu1 %v878_v34  ;;  %777 = vadd.xlane.f32.xlu0 %v1504_v28  ;;  %1527 = vpow2.f32 %v703_v48 }
 0x1db   : > { %v1514_v36 = vpop.eup %1513  ;;  %1529 = vpow2.f32 %v701_v52 }
 0x1dc   : > { %779 = vadd.xlane.f32.xlu1 %v1506_v30  ;;  %v879_v37 = vpack.c.bf16 %v1514_v36, %v1512_v35  ;;  %1531 = vpow2.f32 %v704_v49  ;;  %v846_v49 = vld [vmem:[#allocation4 + $0x28] sm:$0xff] }
 0x1dd   : > { %v1516_v38 = vpop.eup %1515  ;;  %1533 = vpow2.f32 %v702_v51 }
 0x1de   : > { %785 = vadd.xlane.f32.xlu0 %v1512_v35  ;;  %1426 = vmatprep.mubr.bf16.mxu1 %v879_v37  ;;  %1535 = vpow2.f32 %v705_v58  ;;  %v712_v35 = vsub.f32 -inf, %v1841_v27  ;;  %v845_v27 = vld [vmem:[#allocation4 + $0x20] sm:$0xff] }
 0x1df   : > { %v1518_v39 = vpop.eup %1517  ;;  %1537 = vpow2.f32 %v707_v61 }
 0x1e0   : > { %787 = vadd.xlane.f32.xlu1 %v1514_v36  ;;  %v880_v40 = vpack.c.bf16 %v1518_v39, %v1516_v38  ;;  %v1520_v55 = vpop.eup %1519  ;;  %1539 = vpow2.f32 %v706_v63 }
 0x1e1   : > { %v1522_v56 = vpop.eup %1521  ;;  %v795_v0 = vmul.f32 0.0, %v1520_v55  ;;  %1541 = vpow2.f32 %v708_v59  ;;  %v859_v13 = vmul.f32 %v1520_v55, %v843_v7 }
 0x1e2   : > { %789 = vadd.xlane.f32.xlu0 %v1516_v38  ;;  %1427 = vmatmul.mubr.bf16.gmra.mrb[12].mxu1 %v880_v40  ;;  %v1524_v60 = vpop.eup %1523  ;;  %v793_v1 = vmul.f32 0.0, %v1522_v56  ;;  %v857_v20 = vmul.f32 %v1522_v56, %v841_v9 }
 0x1e3   : > { %v1526_v57 = vpop.eup %1525  ;;  %v796_v5 = vmul.f32 0.0, %v1524_v60  ;;  %v860_v22 = vmul.f32 %v1524_v60, %v844_v10 }
 0x1e4   : > { %791 = vadd.xlane.f32.xlu1 %v1518_v39  ;;  %v794_v3 = vmul.f32 0.0, %v1526_v57  ;;  %v1528_v14 = vpop.eup %1527  ;;  %v858_v30 = vmul.f32 %v1526_v57, %v842_v12 }
 0x1e5   : > { %v1530_v16 = vpop.eup %1529  ;;  %v799_v33 = vmul.f32 0.0, %v1528_v14  ;;  %v863_v52 = vmul.f32 %v1528_v14, %v847_v21 }
 0x1e6   : > { %v1532_v23 = vpop.eup %1531  ;;  %v797_v36 = vmul.f32 0.0, %v1530_v16  ;;  %v861_v55 = vmul.f32 %v1530_v16, %v845_v27 }
 0x1e7   : > { %v1534_v31 = vpop.eup %1533  ;;  %v800_v39 = vmul.f32 0.0, %v1532_v23  ;;  %v864_v60 = vmul.f32 %v1532_v23, %v848_v46 }
 0x1e8   : > { %v1872_v44 = vpop.eup %1535  ;;  %v862_v59 = vmul.f32 %v1534_v31, %v846_v49 }
 0x24e   : > { %v766_v42 = vpop.xlane.xlu0 %765 }
 0x24f   : > { %v811_v4 = vadd.f32 %v795_v0, %v766_v42  ;;  %v798_v42 = vmul.f32 0.0, %v1534_v31 }
 0x251   : > { %1543 = vrcp.f32 %v811_v4 }
 0x252   : > { %v768_v45 = vpop.xlane.xlu1 %767  ;;  %v762_v47 = vpop.xlane.xlu0 %761 }
 0x253   : > { %v809_v8 = vadd.f32 %v793_v1, %v762_v47  ;;  %v812_v11 = vadd.f32 %v796_v5, %v768_v45  ;;  %v1538_v47 = vpop.eup %1537 }
 0x255   : > { %1545 = vrcp.f32 %v809_v8 }
 0x256   : > { %v764_v50 = vpop.xlane.xlu1 %763  ;;  %1547 = vrcp.f32 %v812_v11 }
 0x257   : > { %v810_v6 = vadd.f32 %v794_v3, %v764_v50 }
 0x259   : > { %1549 = vrcp.f32 %v810_v6 }
 0x25a   : > { %1551 = vpow2.f32 %v709_v18 }
 0x25b   : > { %v774_v54 = vpop.xlane.xlu0 %773  ;;  %1553 = vpow2.f32 %v711_v25 }
 0x25c   : > { %v815_v38 = vadd.f32 %v799_v33, %v774_v54  ;;  %1555 = vpow2.f32 %v710_v32  ;;  %v1878_v54 = vpop.eup %1539 }
 0x25d   : > { %v1853_v53 = vpop.xlane.xlu1 %775  ;;  %1557 = vpow2.f32 %v712_v35  ;;  %v1542_v56 = vpop.eup %1541 }
 0x25e   : > { %v816_v45 = vadd.f32 %v800_v39, %v1853_v53  ;;  %1559 = vrcp.f32 %v815_v38  ;;  %v1544_v61 = vpop.eup %1543  ;;  %v804_v11 = vmul.f32 0.0, %v1542_v56 }
 0x25f   : > { %v770_v62 = vpop.xlane.xlu0 %769  ;;  %v1546_v1 = vpop.eup %1545 }
 0x260   : > { %v813_v41 = vadd.f32 %v797_v36, %v770_v62  ;;  %v803_v62 = vmul.f32 0.0, %v1538_v47  ;;  %v1548_v9 = vpop.eup %1547 }
 0x261   : > { %v1859_v2 = vpop.xlane.xlu1 %771 }
 0x262   : > { %v814_v48 = vadd.f32 %v798_v42, %v1859_v2  ;;  %1561 = vrcp.f32 %v813_v41  ;;  %v801_v2 = vmul.f32 0.0, %v1872_v44 }
 0x263   : > { %v1861_v15 = vpop.xlane.xlu0 %781  ;;  %1563 = vrcp.f32 %v816_v45  ;;  %v1550_v16 = vpop.eup %1549 }
 0x264   : > { %1565 = vrcp.f32 %v814_v48  ;;  %v819_v10 = vadd.f32 %v803_v62, %v1861_v15  ;;  %v849_v15 = vld [vmem:[#allocation4 + $0x40] sm:$0xff]  ;;  %v1897_v25 = vpop.eup %1551 }
 0x265   : > { %v1865_v26 = vpop.xlane.xlu1 %783  ;;  %v1554_v31 = vpop.eup %1553  ;;  %v805_v46 = vmul.f32 0.0, %v1897_v25 }
 0x266   : > { %1567 = vrcp.f32 %v819_v10  ;;  %v807_v21 = vmul.f32 0.0, %v1554_v31 }
 0x267   : > { %v778_v43 = vpop.xlane.xlu0 %777 }
 0x268   : > { %v817_v18 = vadd.f32 %v801_v2, %v778_v43  ;;  %v856_v2 = vld [vmem:[#allocation4 + $0x78] sm:$0xff] }
 0x269   : > { %v780_v50 = vpop.xlane.xlu1 %779 }
 0x26a   : > { %1569 = vrcp.f32 %v817_v18 }
 0x26b   : > { %v1886_v4 = vpop.xlane.xlu0 %785 }
 0x29c   : > { %v1416_v19 = vpop.f32.mrb[0].mxu1 }
 0x29d   : > { %v1028_v28 = vadd.f32 %v1416_v19, %v859_v13  ;;  %v963_v29 = vpop.f32.mrb[1].mxu1  ;;  %v851_v13 = vld [vmem:[#allocation4 + $0x50] sm:$0xff]  ;;  %v802_v19 = vmul.f32 0.0, %v1878_v54 }
 0x29e   : > { %v1026_v34 = vadd.f32 %v963_v29, %v857_v20  ;;  %v1417_v17 = vpop.f32.mrb[2].mxu1  ;;  %v1892_v20 = vpop.xlane.xlu1 %787  ;;  %v867_v33 = vmul.f32 %v1538_v47, %v851_v13 }
 0x29f   : > { %1044 = vst.msk [vmem:[#allocation4 + $0x10] sm:$0xff] %vm326_vm0, %v1028_v28  ;;  %v1029_v24 = vadd.f32 %v1417_v17, %v860_v22  ;;  %v966_v37 = vpop.f32.mrb[3].mxu1  ;;  %v820_v28 = vadd.f32 %v804_v11, %v1865_v26  ;;  %v818_v32 = vadd.f32 %v802_v19, %v780_v50  ;;  %v1905_v17 = vpop.eup %1555  ;;  %v865_v26 = vmul.f32 %v1872_v44, %v849_v15 }
 0x2a0   : > { %1042 = vst.msk [vmem:[#allocation4] sm:$0xff] %vm326_vm0, %v1026_v34  ;;  %v1027_v40 = vadd.f32 %v966_v37, %v858_v30  ;;  %v852_v30 = vld [vmem:[#allocation4 + $0x58] sm:$0xff]  ;;  %v850_v34 = vld [vmem:[#allocation4 + $0x48] sm:$0xff]  ;;  %v1558_v36 = vpop.eup %1557  ;;  %v806_v62 = vmul.f32 0.0, %v1905_v17 }
 0x2a1   : > { %1045 = vst.msk [vmem:[#allocation4 + $0x18] sm:$0xff] %vm326_vm0, %v1029_v24  ;;  %v790_v24 = vpop.xlane.xlu0 %789  ;;  %v868_v39 = vmul.f32 %v1542_v56, %v852_v30  ;;  %1571 = vrcp.f32 %v820_v28  ;;  %v866_v27 = vmul.f32 %v1878_v54, %v850_v34  ;;  %v872_v11 = vmul.f32 %v1558_v36, %v856_v2 }
 0x2a2   : > { %1043 = vst.msk [vmem:[#allocation4 + $0x8] sm:$0xff] %vm326_vm0, %v1027_v40  ;;  %v1560_v40 = vpop.eup %1559  ;;  %1573 = vrcp.f32 %v818_v32  ;;  %v792_v47 = vpop.xlane.xlu1 %791 }
 0x2a3   : > { %v1562_v45 = vpop.eup %1561 }
 0x2a4   : > { %v1564_v49 = vpop.eup %1563 }
 0x2a5   : > { %v1420_v51 = vpop.f32.mrb[4].mxu1 }
 0x2a6   : > { %v1032_v58 = vadd.f32 %v1420_v51, %v863_v52  ;;  %v979_v53 = vpop.f32.mrb[5].mxu1  ;;  %v1111_v57 = vld [vmem:[#allocation4 + $0x10] sm:$0xff]  ;;  %v823_v51 = vadd.f32 %v807_v21, %v790_v24 }
 0x2a7   : > { %v1030_v63 = vadd.f32 %v979_v53, %v861_v55  ;;  %v1421_v0 = vpop.f32.mrb[6].mxu1  ;;  %v1127_v5 = vmul.f32 %v1544_v61, %v1111_v57  ;;  %v1109_v7 = vld [vmem:[#allocation4] sm:$0xff]  ;;  %v808_v55 = vmul.f32 0.0, %v1558_v36  ;;  %v855_v53 = vld [vmem:[#allocation4 + $0x70] sm:$0xff]  ;;  %v821_v61 = vadd.f32 %v805_v46, %v1886_v4 }
 0x2a8   : > { %1048 = vst.msk [vmem:[#allocation4 + $0x30] sm:$0xff] %vm326_vm0, %v1032_v58  ;;  %v1033_v8 = vadd.f32 %v1421_v0, %v864_v60  ;;  %v982_v3 = vpop.f32.mrb[7].mxu1  ;;  %v1125_v12 = vmul.f32 %v1546_v1, %v1109_v7  ;;  %v1112_v14 = vld [vmem:[#allocation4 + $0x18] sm:$0xff]  ;;  %v1566_v60 = vpop.eup %1565  ;;  %v853_v0 = vld [vmem:[#allocation4 + $0x60] sm:$0xff]  ;;  %v871_v4 = vmul.f32 %v1554_v31, %v855_v53  ;;  %v854_v7 = vld [vmem:[#allocation4 + $0x68] sm:$0xff]  ;;  %1575 = vrcp.f32 %v823_v51 }
 0x2a9   : > { %1046 = vst.msk [vmem:[#allocation4 + $0x20] sm:$0xff] %vm326_vm0, %v1030_v63  ;;  %v1031_v6 = vadd.f32 %v982_v3, %v862_v59  ;;  %1143 = vst.msk [vmem:[%s1883_s29 + $0x10] sm:$0xff] %vm326_vm0, %v1127_v5  ;;  %v1128_v22 = vmul.f32 %v1548_v9, %v1112_v14  ;;  %v1110_v23 = vld [vmem:[#allocation4 + $0x8] sm:$0xff]  ;;  %v824_v59 = vadd.f32 %v808_v55, %v792_v47  ;;  %1577 = vrcp.f32 %v821_v61 }
 0x2aa   : > { %1049 = vst.msk [vmem:[#allocation4 + $0x38] sm:$0xff] %vm326_vm0, %v1033_v8  ;;  %1141 = vst.msk [vmem:[%s1883_s29] sm:$0xff] %vm326_vm0, %v1125_v12  ;;  %v1126_v29 = vmul.f32 %v1550_v16, %v1110_v23  ;;  %v822_v5 = vadd.f32 %v806_v62, %v1892_v20  ;;  %v869_v3 = vmul.f32 %v1897_v25, %v853_v0  ;;  %v1568_v12 = vpop.eup %1567 }
 0x2ab   : > { %1047 = vst.msk [vmem:[#allocation4 + $0x28] sm:$0xff] %vm326_vm0, %v1031_v6  ;;  %1144 = vst.msk [vmem:[%s1883_s29 + $0x18] sm:$0xff] %vm326_vm0, %v1128_v22  ;;  %1579 = vrcp.f32 %v824_v59  ;;  %v870_v16 = vmul.f32 %v1905_v17, %v854_v7  ;;  %v1570_v18 = vpop.eup %1569 }
 0x2ac   : > { %1142 = vst.msk [vmem:[%s1883_s29 + $0x8] sm:$0xff] %vm326_vm0, %v1126_v29  ;;  %1581 = vrcp.f32 %v822_v5  ;;  %v1572_v15 = vpop.eup %1571 }
 0x2ad   : > { %v1424_v35 = vpop.f32.mrb[8].mxu1  ;;  %v1574_v30 = vpop.eup %1573 }
 0x2ae   : > { %v1036_v37 = vadd.f32 %v1424_v35, %v867_v33  ;;  %v995_v38 = vpop.f32.mrb[9].mxu1 }
 0x2af   : > { %v1115_v41 = vld [vmem:[#allocation4 + $0x30] sm:$0xff]  ;;  %v1034_v42 = vadd.f32 %v995_v38, %v865_v26  ;;  %v1425_v43 = vpop.f32.mrb[10].mxu1 }
 0x2b0   : > { %v1131_v44 = vmul.f32 %v1560_v40, %v1115_v41  ;;  %v1113_v48 = vld [vmem:[#allocation4 + $0x20] sm:$0xff]  ;;  %1052 = vst.msk [vmem:[#allocation4 + $0x50] sm:$0xff] %vm326_vm0, %v1036_v37  ;;  %v1037_v50 = vadd.f32 %v1425_v43, %v868_v39  ;;  %v998_v52 = vpop.f32.mrb[11].mxu1 }
 0x2b1   : > { %v1129_v56 = vmul.f32 %v1562_v45, %v1113_v48  ;;  %v1116_v58 = vld [vmem:[#allocation4 + $0x38] sm:$0xff]  ;;  %1050 = vst.msk [vmem:[#allocation4 + $0x40] sm:$0xff] %vm326_vm0, %v1034_v42  ;;  %v1035_v54 = vadd.f32 %v998_v52, %v866_v27 }
 0x2b2   : > { %1147 = vst.msk [vmem:[%s1883_s29 + $0x30] sm:$0xff] %vm326_vm0, %v1131_v44  ;;  %v1132_v57 = vmul.f32 %v1564_v49, %v1116_v58  ;;  %v1114_v63 = vld [vmem:[#allocation4 + $0x28] sm:$0xff]  ;;  %1053 = vst.msk [vmem:[#allocation4 + $0x58] sm:$0xff] %vm326_vm0, %v1037_v50  ;;  %v1576_v34 = vpop.eup %1575 }
 0x2b3   : > { %1145 = vst.msk [vmem:[%s1883_s29 + $0x20] sm:$0xff] %vm326_vm0, %v1129_v56  ;;  %v1130_v1 = vmul.f32 %v1566_v60, %v1114_v63  ;;  %1051 = vst.msk [vmem:[#allocation4 + $0x48] sm:$0xff] %vm326_vm0, %v1035_v54  ;;  %v1578_v35 = vpop.eup %1577 }
 0x2b4   : > { %1148 = vst.msk [vmem:[%s1883_s29 + $0x38] sm:$0xff] %vm326_vm0, %v1132_v57 }
 0x2b5   : > { %1146 = vst.msk [vmem:[%s1883_s29 + $0x28] sm:$0xff] %vm326_vm0, %v1130_v1  ;;  %v1428_v8 = vpop.f32.mrb[12].mxu1  ;;  %v1580_v24 = vpop.eup %1579 }
 0x2b6   : > { %v1040_v9 = vadd.f32 %v1428_v8, %v871_v4  ;;  %v1011_v10 = vpop.f32.mrb[13].mxu1  ;;  %v1582_v39 = vpop.eup %1581 }
 0x2b7   : > { %v1119_v14 = vld [vmem:[#allocation4 + $0x50] sm:$0xff]  ;;  %v1038_v6 = vadd.f32 %v1011_v10, %v869_v3  ;;  %v1429_v13 = vpop.f32.mrb[14].mxu1 }
 0x2b8   : > { %v1135_v19 = vmul.f32 %v1568_v12, %v1119_v14  ;;  %v1117_v20 = vld [vmem:[#allocation4 + $0x40] sm:$0xff]  ;;  %1056 = vst.msk [vmem:[#allocation4 + $0x70] sm:$0xff] %vm326_vm0, %v1040_v9  ;;  %v1041_v22 = vadd.f32 %v1429_v13, %v872_v11  ;;  %v1014_v23 = vpop.f32.mrb[15].mxu1 }
 0x2b9   : > { %v1133_v25 = vmul.f32 %v1570_v18, %v1117_v20  ;;  %v1120_v28 = vld [vmem:[#allocation4 + $0x58] sm:$0xff]  ;;  %1054 = vst.msk [vmem:[#allocation4 + $0x60] sm:$0xff] %vm326_vm0, %v1038_v6  ;;  %v1039_v29 = vadd.f32 %v1014_v23, %v870_v16 }
 0x2ba   : > { %1151 = vst.msk [vmem:[%s1883_s29 + $0x50] sm:$0xff] %vm326_vm0, %v1135_v19  ;;  %v1136_v31 = vmul.f32 %v1572_v15, %v1120_v28  ;;  %v1118_v32 = vld [vmem:[#allocation4 + $0x48] sm:$0xff]  ;;  %1057 = vst.msk [vmem:[#allocation4 + $0x78] sm:$0xff] %vm326_vm0, %v1041_v22 }
 0x2bb   : > { %1149 = vst.msk [vmem:[%s1883_s29 + $0x40] sm:$0xff] %vm326_vm0, %v1133_v25  ;;  %v1134_v33 = vmul.f32 %v1574_v30, %v1118_v32  ;;  %1055 = vst.msk [vmem:[#allocation4 + $0x68] sm:$0xff] %vm326_vm0, %v1039_v29 }
 0x2bc   : > { %1152 = vst.msk [vmem:[%s1883_s29 + $0x58] sm:$0xff] %vm326_vm0, %v1136_v31 }
 0x2bd   : > { %1150 = vst.msk [vmem:[%s1883_s29 + $0x48] sm:$0xff] %vm326_vm0, %v1134_v33 }
 0x2bf   : > { %v1123_v17 = vld [vmem:[#allocation4 + $0x70] sm:$0xff] }
 0x2c0   : > { %v1139_v26 = vmul.f32 %v1576_v34, %v1123_v17  ;;  %v1121_v36 = vld [vmem:[#allocation4 + $0x60] sm:$0xff] }
 0x2c1   : > { %v1137_v37 = vmul.f32 %v1578_v35, %v1121_v36  ;;  %v1124_v38 = vld [vmem:[#allocation4 + $0x78] sm:$0xff] }
 0x2c2   : > { %1155 = vst.msk [vmem:[%s1883_s29 + $0x70] sm:$0xff] %vm326_vm0, %v1139_v26  ;;  %v1140_v40 = vmul.f32 %v1580_v24, %v1124_v38  ;;  %v1122_v21 = vld [vmem:[#allocation4 + $0x68] sm:$0xff] }
 0x2c3   : > { %1153 = vst.msk [vmem:[%s1883_s29 + $0x60] sm:$0xff] %vm326_vm0, %v1137_v37  ;;  %v1138_v41 = vmul.f32 %v1582_v39, %v1122_v21 }
 0x2c4   : > { %1156 = vst.msk [vmem:[%s1883_s29 + $0x78] sm:$0xff] %vm326_vm0, %v1140_v40 }
 0x2c5   : > { %1154 = vst.msk [vmem:[%s1883_s29 + $0x68] sm:$0xff] %vm326_vm0, %v1138_v41 }
 0x2c6 PF: > { %s13_s14 = sadd.s32 1, %s1605_s14   ;;  %s1962_s12 = smov %s1601_s13 }
 0x2c7   : > { %p10_p5 = scmp.ge.s32.totalorder %s13_s14, 6   ;;  %s1963_s13 = smov %s1965_s15 }
 0x2c9   :  { %12 = sbr.rel (!%p10_p5) target bundleno = 2 (0x2), region = 76 }

</bundles_post_ra>
